<compile_context>
chip_gen: v7x
topology: tpu7x:2x2x1
jax: 0.10.0
libtpu: 0.0.40
codegen_flags: <defaults>
</compile_context>

<pallas_src>
import jax
import jax.numpy as jnp
from jax.experimental import pallas as pl
from jax.experimental.pallas import tpu as pltpu

LANE = 128      # lane width (last-dim tiling)
SUBLANE = 8     # f32 sublane width (second-to-last-dim tiling)
_BN_EPS = 1e-5


def _round_up(x, m):
    return (x + m - 1) // m * m


def _vmem_spec():
    return pl.BlockSpec(memory_space=pltpu.MemorySpace.VMEM)


def _vpu_has_bf16():
    """bf16 VALU exists on v6e/v7x; v5e-and-older compute elementwise in f32."""
    try:
        kind = jax.devices()[0].device_kind.lower()
    except Exception:
        return True
    return not any(tag in kind for tag in ("v2", "v3", "v4", "v5"))


def _make_fused_mlp_kernel(num_layers, n_true, n_pad, h_pad, affine_bf16):
    """Fused kernel.  refs = (x, [w, gamma, beta] * (L-1), w_last, b_last, out).

    Hidden-layer weights are [D_in, h_pad] bf16 (pre-transposed, zero-padded lanes);
    gamma/beta and the final bias are [1, h_pad] f32.  The activation stays resident
    in VMEM/vregs across the statically-unrolled layer loop.
    """
    inv_n = 1.0 / float(n_true)

    def kernel(*refs):
        x_ref = refs[0]
        o_ref = refs[-1]
        h = x_ref[...].astype(jnp.bfloat16)              # in-kernel cast (no wrapper convert)
        idx = 1

        if num_layers > 1:
            # Hoisted once (JAX does not CSE broadcasts inside the unrolled loop).
            ones_row = jnp.ones((1, n_pad), jnp.float32)
            if n_pad != n_true:
                row_mask = (
                    jax.lax.broadcasted_iota(jnp.int32, (n_pad, h_pad), 0) < n_true
                ).astype(jnp.bfloat16)

        for _ in range(num_layers - 1):
            w_ref, g_ref, be_ref = refs[idx], refs[idx + 1], refs[idx + 2]
            idx += 3
            # Linear (no bias: BN makes a pre-BN bias a mathematical no-op).
            y = jnp.dot(h, w_ref[...], preferred_element_type=jnp.float32)   # [Np, h_pad] f32

            # Batch sums on the MXU (vector-extended slot has slack; VALU is the
            # binding slot).  Divide by the TRUE batch size (padded rows are zero).
            sum_y = jnp.dot(ones_row, y, preferred_element_type=jnp.float32)        # [1, h_pad]
            sum_y2 = jnp.dot(ones_row, y * y, preferred_element_type=jnp.float32)   # [1, h_pad]
            mean = sum_y * inv_n
            var = jnp.maximum(sum_y2 * inv_n - mean * mean, 0.0)   # clamp: f32 cancellation guard

            # BN affine folded into per-feature scale/shift ([1, h_pad] domain only).
            scale = g_ref[...] * jax.lax.rsqrt(var + _BN_EPS)
            shift = be_ref[...] - mean * scale

            if affine_bf16:
                # v6e/v7x: bf16 VALU doubles elementwise throughput; stats stayed f32.
                z = (y.astype(jnp.bfloat16) * scale.astype(jnp.bfloat16)
                     + shift.astype(jnp.bfloat16))
                h = jnp.maximum(z, 0.0)
            else:
                h = jnp.maximum(y * scale + shift, 0.0).astype(jnp.bfloat16)

            if n_pad != n_true:
                # Keep padded rows exactly zero so they stay neutral for the next
                # layer's (bias-free) matmul and batch statistics.
                h = h * row_mask

        # Final linear keeps its bias (no BN after it).
        w_ref, b_ref = refs[idx], refs[idx + 1]
        y = jnp.dot(h, w_ref[...], preferred_element_type=jnp.float32) + b_ref[...]
        o_ref[...] = y.astype(o_ref.dtype)

    return kernel


def init_mlp_params(key, num_layers, input_dim, hidden_dim):
    """Synthetic params in PyTorch convention (Linear weight: [out, in], f32)."""
    if num_layers < 1:
        raise ValueError("number of layers should be positive!")
    params = {"linears": [], "bn": []}
    dims_in = [input_dim] + [hidden_dim] * (num_layers - 1)
    dims_out = [hidden_dim] * num_layers
    for i in range(num_layers):
        key, kw, kb = jax.random.split(key, 3)
        bound = 1.0 / jnp.sqrt(dims_in[i])
        w = jax.random.uniform(kw, (dims_out[i], dims_in[i]), jnp.float32, -bound, bound)
        b = jax.random.uniform(kb, (dims_out[i],), jnp.float32, -bound, bound)
        params["linears"].append((w, b))
    for _ in range(num_layers - 1):
        params["bn"].append((jnp.ones((hidden_dim,), jnp.float32),
                             jnp.zeros((hidden_dim,), jnp.float32)))
    return params


def prepare_mlp_params(params, num_layers, hidden_dim):
    """One-time (init-time) conversion to kernel-ready layout.

    - transpose weights to [D_in, D_out], zero-pad features to 128 lanes, cast bf16
    - drop hidden-layer biases entirely (BN absorbs them); keep the final bias
    - gamma / beta / final bias -> [1, h_pad] f32
    """
    h_pad = _round_up(hidden_dim, LANE)
    dev = {"linears": [], "bn": [], "hidden_dim": hidden_dim, "h_pad": h_pad,
           "true_dims": []}
    for i, (w, b) in enumerate(params["linears"]):
        d_out, d_in = w.shape
        d_in_pad = d_in if i == 0 else h_pad          # hidden activations are h_pad wide
        wt = (jnp.zeros((d_in_pad, h_pad), jnp.float32)
              .at[:d_in, :d_out].set(w.T).astype(jnp.bfloat16))
        if i == num_layers - 1:
            bp = jnp.zeros((1, h_pad), jnp.float32).at[0, :d_out].set(b)
            dev["linears"].append((wt, bp))
        else:
            dev["linears"].append((wt, None))         # bias folded away by BatchNorm
        dev["true_dims"].append((d_in, d_out))
    for gamma, beta in params["bn"]:
        d = gamma.shape[0]
        gp = jnp.zeros((1, h_pad), jnp.float32).at[0, :d].set(gamma)
        bp = jnp.zeros((1, h_pad), jnp.float32).at[0, :d].set(beta)
        dev["bn"].append((gp, bp))
    return dev


def mlp_forward(dev_params, x, num_layers):
    """Pallas-backed forward matching MLP.forward (single fused pallas_call)."""
    n, _ = x.shape
    h_pad = dev_params["h_pad"]
    hidden_dim = dev_params["hidden_dim"]

    # BN statistics must be over the TRUE batch; zero-pad rows to the f32 sublane
    # granularity and divide by n inside the kernel (padded rows stay exactly zero).
    n_pad = _round_up(n, SUBLANE)
    x_padded = x if n_pad == n else jnp.pad(x, ((0, n_pad - n), (0, 0)))

    args = [x_padded]                                  # f32; cast to bf16 in-kernel
    flops = 0
    for i in range(num_layers - 1):
        wt, _ = dev_params["linears"][i]
        g, be = dev_params["bn"][i]
        args += [wt, g, be]
        d_in, d_out = dev_params["true_dims"][i]
        flops += 2 * n * d_in * d_out + 4 * n * d_out  # matmul + MXU stat sums (true dims)
    wt, b = dev_params["linears"][-1]
    args += [wt, b]
    d_in, d_out = dev_params["true_dims"][-1]
    flops += 2 * n * d_in * d_out

    arg_bytes = sum(int(a.size) * a.dtype.itemsize for a in args)
    out_bytes = n_pad * h_pad * 4

    # Everything (inputs, output, live intermediates) is VMEM-resident: size the scoped
    # VMEM limit from the actual buffers instead of relying on the 16/32 MiB default.
    scratch_est = n_pad * h_pad * (4 + 4 + 2) + (1 << 20)   # y(f32), y*y(f32), h(bf16) + slack
    vmem_limit = int(min(64 << 20, max(32 << 20, arg_bytes + out_bytes + scratch_est)))

    kernel = _make_fused_mlp_kernel(num_layers, n, n_pad, h_pad, _vpu_has_bf16())

    out_padded = pl.pallas_call(
        kernel,
        out_shape=jax.ShapeDtypeStruct((n_pad, h_pad), jnp.float32),
        in_specs=[_vmem_spec()] * len(args),
        out_specs=_vmem_spec(),
        compiler_params=pltpu.CompilerParams(vmem_limit_bytes=vmem_limit),
        cost_estimate=pl.CostEstimate(
            flops=int(flops),
            transcendentals=(num_layers - 1) * hidden_dim,
            bytes_accessed=int(arg_bytes + out_bytes),
        ),
    )(*args)
    # Strip batch-row and lane padding back to the module's [n, hidden_dim] output.
    return out_padded[:n, :hidden_dim]


def mlp_forward_ref(params, x, num_layers):
    """Pure-JAX f32 reference (PyTorch semantics, biases included) for checking."""
    if num_layers == 1:
        w, b = params["linears"][0]
        return x @ w.T + b
    h = x
    for i in range(num_layers - 1):
        w, b = params["linears"][i]
        gamma, beta = params["bn"][i]
        y = h @ w.T + b
        mean = jnp.mean(y, axis=0, keepdims=True)
        var = jnp.mean((y - mean) ** 2, axis=0, keepdims=True)
        y_hat = (y - mean) / jnp.sqrt(var + _BN_EPS)
        h = jnp.maximum(y_hat * gamma + beta, 0.0)
    w, b = params["linears"][-1]
    return h @ w.T + b


def _check(params, dev_params, x, num_layers, hidden_dim, tag):
    out = jax.block_until_ready(mlp_forward(dev_params, x, num_layers))
    ref = mlp_forward_ref(params, x, num_layers)
    assert out.shape == (x.shape[0], hidden_dim), (tag, out.shape)
    # Tolerance loosened vs. pure-f32: matmul operands (and v6e/v7x affine math) are bf16;
    # accumulation and BN statistics are f32 and activations are O(1) after BN.
    assert jnp.allclose(out, ref, atol=5e-2, rtol=5e-2), f"mismatch vs reference ({tag})"


if __name__ == "__main__":
    num_layers = 3
    input_dim = 16
    hidden_dim = 32
    output_dim = 5   # stored by the module but unused in forward (final layer is hidden_dim wide)
    batch = 8        # batch stats are over the true batch; kernel pads rows internally

    key = jax.random.PRNGKey(0)
    key, kx = jax.random.split(key)
    x = jax.random.normal(kx, (batch, input_dim), jnp.float32)

    params = init_mlp_params(key, num_layers, input_dim, hidden_dim)
    dev_params = prepare_mlp_params(params, num_layers, hidden_dim)

    # Main check: 3-layer MLP, aligned batch (no row padding / masking emitted).
    _check(params, dev_params, x, num_layers, hidden_dim, "L3_b8")

    # Unaligned batch: exercises zero-row padding + true-N stats + row-mask path.
    key, kx2 = jax.random.split(key)
    x6 = jax.random.normal(kx2, (6, input_dim), jnp.float32)
    _check(params, dev_params, x6, num_layers, hidden_dim, "L3_b6")

    # Single-layer (pure Linear) path.
    params1 = init_mlp_params(jax.random.PRNGKey(1), 1, input_dim, hidden_dim)
    dev_params1 = prepare_mlp_params(params1, 1, hidden_dim)
    _check(params1, dev_params1, x, 1, hidden_dim, "L1_b8")

    print("KERNEL_OK")
</pallas_src>

<mosaic_0001>
module attributes {stable_mosaic.version = 11 : i64} {
  func.func @kernel(%arg0: memref<8x16xf32, #tpu.memory_space<vmem>>, %arg1: memref<16x128xbf16, #tpu.memory_space<vmem>>, %arg2: memref<1x128xf32, #tpu.memory_space<vmem>>, %arg3: memref<1x128xf32, #tpu.memory_space<vmem>>, %arg4: memref<128x128xbf16, #tpu.memory_space<vmem>>, %arg5: memref<1x128xf32, #tpu.memory_space<vmem>>, %arg6: memref<1x128xf32, #tpu.memory_space<vmem>>, %arg7: memref<128x128xbf16, #tpu.memory_space<vmem>>, %arg8: memref<1x128xf32, #tpu.memory_space<vmem>>, %arg9: memref<8x128xf32, #tpu.memory_space<vmem>>) attributes {dimension_semantics = [], scalar_prefetch = 0 : i64, scratch_operands = 0 : i64, tpu.core_type = #tpu.core_type<tc>} {
    %c0 = arith.constant 0 : index
    %c0_0 = arith.constant 0 : index
    %0 = vector.load %arg0[%c0, %c0_0] : memref<8x16xf32, #tpu.memory_space<vmem>>, vector<8x16xf32>
    %1 = arith.truncf %0 : vector<8x16xf32> to vector<8x16xbf16>
    %cst = arith.constant 1.000000e+00 : f32
    %2 = vector.broadcast %cst : f32 to vector<1x8xf32>
    %c0_1 = arith.constant 0 : index
    %c0_2 = arith.constant 0 : index
    %3 = vector.load %arg1[%c0_1, %c0_2] : memref<16x128xbf16, #tpu.memory_space<vmem>>, vector<16x128xbf16>
    %cst_3 = arith.constant dense<0.000000e+00> : vector<8x128xf32>
    %4 = tpu.matmul %1, %3, %cst_3 {dimension_numbers = #tpu.dot_dimension_numbers<[1], [0], [0], [1], [0, 0, 1, 1], [], []>} : vector<8x16xbf16>, vector<16x128xbf16>, vector<8x128xf32> -> vector<8x128xf32>
    %cst_4 = arith.constant dense<0.000000e+00> : vector<1x128xf32>
    %5 = tpu.matmul %2, %4, %cst_4 {dimension_numbers = #tpu.dot_dimension_numbers<[1], [0], [0], [1], [0, 0, 1, 1], [], []>} : vector<1x8xf32>, vector<8x128xf32>, vector<1x128xf32> -> vector<1x128xf32>
    %6 = arith.mulf %4, %4 : vector<8x128xf32>
    %cst_5 = arith.constant dense<0.000000e+00> : vector<1x128xf32>
    %7 = tpu.matmul %2, %6, %cst_5 {dimension_numbers = #tpu.dot_dimension_numbers<[1], [0], [0], [1], [0, 0, 1, 1], [], []>} : vector<1x8xf32>, vector<8x128xf32>, vector<1x128xf32> -> vector<1x128xf32>
    %cst_6 = arith.constant 1.250000e-01 : f32
    %8 = vector.broadcast %cst_6 : f32 to vector<1x128xf32>
    %9 = arith.mulf %5, %8 : vector<1x128xf32>
    %cst_7 = arith.constant 1.250000e-01 : f32
    %10 = vector.broadcast %cst_7 : f32 to vector<1x128xf32>
    %11 = arith.mulf %7, %10 : vector<1x128xf32>
    %12 = arith.mulf %9, %9 : vector<1x128xf32>
    %13 = arith.subf %11, %12 : vector<1x128xf32>
    %cst_8 = arith.constant 0.000000e+00 : f32
    %14 = vector.broadcast %cst_8 : f32 to vector<1x128xf32>
    %15 = arith.maximumf %13, %14 : vector<1x128xf32>
    %c0_9 = arith.constant 0 : index
    %c0_10 = arith.constant 0 : index
    %16 = vector.load %arg2[%c0_9, %c0_10] : memref<1x128xf32, #tpu.memory_space<vmem>>, vector<1x128xf32>
    %cst_11 = arith.constant 9.99999974E-6 : f32
    %17 = vector.broadcast %cst_11 : f32 to vector<1x128xf32>
    %18 = arith.addf %15, %17 : vector<1x128xf32>
    %19 = math.rsqrt %18 : vector<1x128xf32>
    %20 = arith.mulf %16, %19 : vector<1x128xf32>
    %c0_12 = arith.constant 0 : index
    %c0_13 = arith.constant 0 : index
    %21 = vector.load %arg3[%c0_12, %c0_13] : memref<1x128xf32, #tpu.memory_space<vmem>>, vector<1x128xf32>
    %22 = arith.mulf %9, %20 : vector<1x128xf32>
    %23 = arith.subf %21, %22 : vector<1x128xf32>
    %24 = arith.truncf %4 : vector<8x128xf32> to vector<8x128xbf16>
    %25 = arith.truncf %20 : vector<1x128xf32> to vector<1x128xbf16>
    %26 = vector.broadcast %25 : vector<1x128xbf16> to vector<8x128xbf16>
    %27 = arith.mulf %24, %26 : vector<8x128xbf16>
    %28 = arith.truncf %23 : vector<1x128xf32> to vector<1x128xbf16>
    %29 = vector.broadcast %28 : vector<1x128xbf16> to vector<8x128xbf16>
    %30 = arith.addf %27, %29 : vector<8x128xbf16>
    %cst_14 = arith.constant 0.000000e+00 : bf16
    %31 = vector.broadcast %cst_14 : bf16 to vector<8x128xbf16>
    %32 = arith.maximumf %30, %31 : vector<8x128xbf16>
    %c0_15 = arith.constant 0 : index
    %c0_16 = arith.constant 0 : index
    %33 = vector.load %arg4[%c0_15, %c0_16] : memref<128x128xbf16, #tpu.memory_space<vmem>>, vector<128x128xbf16>
    %cst_17 = arith.constant dense<0.000000e+00> : vector<8x128xf32>
    %34 = tpu.matmul %32, %33, %cst_17 {dimension_numbers = #tpu.dot_dimension_numbers<[1], [0], [0], [1], [0, 0, 1, 1], [], []>} : vector<8x128xbf16>, vector<128x128xbf16>, vector<8x128xf32> -> vector<8x128xf32>
    %cst_18 = arith.constant dense<0.000000e+00> : vector<1x128xf32>
    %35 = tpu.matmul %2, %34, %cst_18 {dimension_numbers = #tpu.dot_dimension_numbers<[1], [0], [0], [1], [0, 0, 1, 1], [], []>} : vector<1x8xf32>, vector<8x128xf32>, vector<1x128xf32> -> vector<1x128xf32>
    %36 = arith.mulf %34, %34 : vector<8x128xf32>
    %cst_19 = arith.constant dense<0.000000e+00> : vector<1x128xf32>
    %37 = tpu.matmul %2, %36, %cst_19 {dimension_numbers = #tpu.dot_dimension_numbers<[1], [0], [0], [1], [0, 0, 1, 1], [], []>} : vector<1x8xf32>, vector<8x128xf32>, vector<1x128xf32> -> vector<1x128xf32>
    %cst_20 = arith.constant 1.250000e-01 : f32
    %38 = vector.broadcast %cst_20 : f32 to vector<1x128xf32>
    %39 = arith.mulf %35, %38 : vector<1x128xf32>
    %cst_21 = arith.constant 1.250000e-01 : f32
    %40 = vector.broadcast %cst_21 : f32 to vector<1x128xf32>
    %41 = arith.mulf %37, %40 : vector<1x128xf32>
    %42 = arith.mulf %39, %39 : vector<1x128xf32>
    %43 = arith.subf %41, %42 : vector<1x128xf32>
    %cst_22 = arith.constant 0.000000e+00 : f32
    %44 = vector.broadcast %cst_22 : f32 to vector<1x128xf32>
    %45 = arith.maximumf %43, %44 : vector<1x128xf32>
    %c0_23 = arith.constant 0 : index
    %c0_24 = arith.constant 0 : index
    %46 = vector.load %arg5[%c0_23, %c0_24] : memref<1x128xf32, #tpu.memory_space<vmem>>, vector<1x128xf32>
    %cst_25 = arith.constant 9.99999974E-6 : f32
    %47 = vector.broadcast %cst_25 : f32 to vector<1x128xf32>
    %48 = arith.addf %45, %47 : vector<1x128xf32>
    %49 = math.rsqrt %48 : vector<1x128xf32>
    %50 = arith.mulf %46, %49 : vector<1x128xf32>
    %c0_26 = arith.constant 0 : index
    %c0_27 = arith.constant 0 : index
    %51 = vector.load %arg6[%c0_26, %c0_27] : memref<1x128xf32, #tpu.memory_space<vmem>>, vector<1x128xf32>
    %52 = arith.mulf %39, %50 : vector<1x128xf32>
    %53 = arith.subf %51, %52 : vector<1x128xf32>
    %54 = arith.truncf %34 : vector<8x128xf32> to vector<8x128xbf16>
    %55 = arith.truncf %50 : vector<1x128xf32> to vector<1x128xbf16>
    %56 = vector.broadcast %55 : vector<1x128xbf16> to vector<8x128xbf16>
    %57 = arith.mulf %54, %56 : vector<8x128xbf16>
    %58 = arith.truncf %53 : vector<1x128xf32> to vector<1x128xbf16>
    %59 = vector.broadcast %58 : vector<1x128xbf16> to vector<8x128xbf16>
    %60 = arith.addf %57, %59 : vector<8x128xbf16>
    %cst_28 = arith.constant 0.000000e+00 : bf16
    %61 = vector.broadcast %cst_28 : bf16 to vector<8x128xbf16>
    %62 = arith.maximumf %60, %61 : vector<8x128xbf16>
    %c0_29 = arith.constant 0 : index
    %c0_30 = arith.constant 0 : index
    %63 = vector.load %arg7[%c0_29, %c0_30] : memref<128x128xbf16, #tpu.memory_space<vmem>>, vector<128x128xbf16>
    %cst_31 = arith.constant dense<0.000000e+00> : vector<8x128xf32>
    %64 = tpu.matmul %62, %63, %cst_31 {dimension_numbers = #tpu.dot_dimension_numbers<[1], [0], [0], [1], [0, 0, 1, 1], [], []>} : vector<8x128xbf16>, vector<128x128xbf16>, vector<8x128xf32> -> vector<8x128xf32>
    %c0_32 = arith.constant 0 : index
    %c0_33 = arith.constant 0 : index
    %65 = vector.load %arg8[%c0_32, %c0_33] : memref<1x128xf32, #tpu.memory_space<vmem>>, vector<1x128xf32>
    %66 = vector.broadcast %65 : vector<1x128xf32> to vector<8x128xf32>
    %67 = arith.addf %64, %66 : vector<8x128xf32>
    %c0_34 = arith.constant 0 : index
    %c0_35 = arith.constant 0 : index
    %68 = vector.load %arg9[%c0_34, %c0_35] : memref<8x128xf32, #tpu.memory_space<vmem>>, vector<8x128xf32>
    tpu.vector_store %arg9[%c0_34, %c0_35], %67 {strides = array<i32>} : memref<8x128xf32, #tpu.memory_space<vmem>>, vector<8x128xf32>,
    return
  }
}

</mosaic_0001>

<bundles_post_ra>
// kernel: tpu_custom_call.1
= control target key start
LH: loop header
LB: loop body
LE: loop exit
PB: predicated region body
PF: predicated region fallthrough
CT: control target
= control target key end

     0   :  { %14 = vsyncpa [#allocation3], 0  ;;  %s1194_s0 = inlined_call_operand.hbm [shape: f32[8,16], index: 0, kind: input, shape index: {}]   ;;  %s1195_s1 = inlined_call_operand.hbm [shape: bf16[16,128], index: 1, kind: input, shape index: {}]   ;;  %s1196_s2 = inlined_call_operand.vmem [shape: f32[1,128], index: 2, kind: input, shape index: {}]   ;;  %s1197_s3 = inlined_call_operand.vmem [shape: f32[1,128], index: 3, kind: input, shape index: {}]   ;;  %s1198_s4 = inlined_call_operand.hbm [shape: bf16[128,128], index: 4, kind: input, shape index: {}]   ;;  %s1199_s5 = inlined_call_operand.vmem [shape: f32[1,128], index: 5, kind: input, shape index: {}]   ;;  %s1200_s6 = inlined_call_operand.vmem [shape: f32[1,128], index: 6, kind: input, shape index: {}]   ;;  %s1201_s7 = inlined_call_operand.hbm [shape: bf16[128,128], index: 7, kind: input, shape index: {}]   ;;  %s1202_s8 = inlined_call_operand.vmem [shape: f32[1,128], index: 8, kind: input, shape index: {}]   ;;  %s1203_s9 = inlined_call_operand.hbm [shape: f32[8,128], index: 9, kind: output, shape index: {}]  }
   0x1   :  { %15 = vsyncpa [#allocation6], 0 }
   0x2   :  { %16 = vsyncpa [#allocation9], 0 }
   0x3   :  { %17 = vsyncpa [#allocation4], 0  ;;  %s991_s30 = smov [#allocation5]   ;;  %s873_s13 = scalar_lea.hbm %s1195_s1, 128 }
   0x4   :  { %s33_s10 = sshll.u32 %s991_s30, 4  ;;  %p874_p0 = scmp.ne.s32.totalorder %s1195_s1, %s873_s13  ;;  %s34_s10 = int_to_ptr.vmem [resolvable:$true] %s33_s10 }
   0x5   :  { %p877_p1 = scmp.lt.u32.totalorder %s873_s13, %s1195_s1 }
   0x7   :  { %p879_p2 = pnand %p877_p1, %p874_p0 }
   0x9   :  { %882 = shalt.err (!%p879_p2)
}
   0xa   :  { %s883_s18 = scalar_lea.vmem %s34_s10, 128  ;;  %p888_p4 = scmp.lt.s32.totalorder %s34_s10, %s34_s10 }
   0xb   :  { %p884_p3 = scmp.ne.s32.totalorder %s34_s10, %s883_s18  ;;  %p889_p5 = scmp.lt.s32.totalorder %s883_s18, %s883_s18 }
   0xd   :  { %p890_p6 = por %p889_p5, %p888_p4 }
   0xf   :  { %p891_p7 = pnand %p890_p6, %p884_p3 }
  0x11   :  { %894 = shalt.err (!%p891_p7)
}
  0x12   :  { %s992_s19 = smov 64   ;;  %s993_s20 = smov 4  }
  0x13   :  { %39 = dma.hbm_to_vmem [thread:$0]  %s1195_s1, 128, %s34_s10, [#allocation6], %s992_s19, %s992_s19, %s993_s20  }
  0x14   :  { %s994_s23 = smov [#allocation2]   ;;  %s995_s25 = smov [#allocation7]  }
  0x15   :  { %s24_s24 = sshll.u32 %s994_s23, 4  ;;  %s49_s26 = sshll.u32 %s995_s25, 4  ;;  %s25_s24 = int_to_ptr.vmem [resolvable:$true] %s24_s24  ;;  %s50_s26 = int_to_ptr.vmem [resolvable:$true] %s49_s26 }
  0x16   :  { %s895_s29 = scalar_lea.hbm %s1194_s0, 128 }
  0x17   :  { %p896_p8 = scmp.ne.s32.totalorder %s1194_s0, %s895_s29  ;;  %p899_p9 = scmp.lt.u32.totalorder %s895_s29, %s1194_s0 }
  0x19   :  { %p901_p10 = pnand %p899_p9, %p896_p8 }
  0x1b   :  { %904 = shalt.err (!%p901_p10)
}
  0x1c   :  { %s905_s1 = scalar_lea.vmem %s25_s24, 128  ;;  %p910_p12 = scmp.lt.s32.totalorder %s25_s24, %s25_s24 }
  0x1d   :  { %p906_p11 = scmp.ne.s32.totalorder %s25_s24, %s905_s1  ;;  %p911_p13 = scmp.lt.s32.totalorder %s905_s1, %s905_s1 }
  0x1f   :  { %p912_p0 = por %p911_p13, %p910_p12 }
  0x21   :  { %p913_p1 = pnand %p912_p0, %p906_p11 }
  0x23   :  { %916 = shalt.err (!%p913_p1)
}
  0x24   :  { %27 = dma.hbm_to_vmem [thread:$0]  %s1194_s0, 128, %s25_s24, [#allocation3]  }
  0x25   :  { %s917_s17 = scalar_lea.hbm %s1198_s4, 1024 }
  0x26   :  { %p918_p2 = scmp.ne.s32.totalorder %s1198_s4, %s917_s17  ;;  %p921_p3 = scmp.lt.u32.totalorder %s917_s17, %s1198_s4 }
  0x28   :  { %p923_p4 = pnand %p921_p3, %p918_p2 }
  0x2a   :  { %926 = shalt.err (!%p923_p4)
}
  0x2b   :  { %s927_s25 = scalar_lea.vmem %s50_s26, 1024  ;;  %p932_p6 = scmp.lt.s32.totalorder %s50_s26, %s50_s26 }
  0x2c   :  { %p928_p5 = scmp.ne.s32.totalorder %s50_s26, %s927_s25  ;;  %p933_p7 = scmp.lt.s32.totalorder %s927_s25, %s927_s25 }
  0x2e   :  { %p934_p8 = por %p933_p7, %p932_p6 }
  0x30   :  { %p935_p9 = pnand %p934_p8, %p928_p5 }
  0x32   :  { %938 = shalt.err (!%p935_p9)
}
  0x33   :  { %55 = dma.hbm_to_vmem [thread:$0]  %s1198_s4, 1024, %s50_s26, [#allocation6], %s992_s19, %s992_s19, %s993_s20  }
  0x34   :  { %s996_s27 = smov [#allocation8]   ;;  %s939_s11 = scalar_lea.hbm %s1201_s7, 1024 }
  0x35   :  { %s65_s28 = sshll.u32 %s996_s27, 4  ;;  %p940_p10 = scmp.ne.s32.totalorder %s1201_s7, %s939_s11  ;;  %s66_s28 = int_to_ptr.vmem [resolvable:$true] %s65_s28 }
  0x36   :  { %p943_p11 = scmp.lt.u32.totalorder %s939_s11, %s1201_s7 }
  0x38   :  { %p945_p12 = pnand %p943_p11, %p940_p10 }
  0x3a   :  { %948 = shalt.err (!%p945_p12)
}
  0x3b   :  { %s949_s14 = scalar_lea.vmem %s66_s28, 1024  ;;  %p954_p0 = scmp.lt.s32.totalorder %s66_s28, %s66_s28 }
  0x3c   :  { %p950_p13 = scmp.ne.s32.totalorder %s66_s28, %s949_s14  ;;  %p955_p1 = scmp.lt.s32.totalorder %s949_s14, %s949_s14 }
  0x3e   :  { %p956_p2 = por %p955_p1, %p954_p0 }
  0x40   :  { %p957_p3 = pnand %p956_p2, %p950_p13 }
  0x42   :  { %960 = shalt.err (!%p957_p3)
}
  0x43   :  { %71 = dma.hbm_to_vmem [thread:$0]  %s1201_s7, 1024, %s66_s28, [#allocation9], %s992_s19, %s992_s19, %s993_s20  }
  0x44   :  { %983 = dma.done.wait [#allocation3], 128  }
  0x45   :  { %984 = vsyncadd [#allocation3], 4294967168 }
  0x46   :  { %985 = dma.done.wait [#allocation6], 1152  }
  0x47   :  { %986 = vsyncadd [#allocation6], 4294966144 }
  0x48   :  { %987 = dma.done.wait [#allocation9], 1024  }
  0x49   :  { %988 = vsyncadd [#allocation9], 4294966272  ;;  %v997_v0 = vmov 0.0   ;;  %vm998_vm0 = vmmov 0   ;;  %v852_v1 = vld [vmem:[#allocation5] sm:$0xff]   ;;  %v87_v2 = vld [vmem:[#allocation2] sm:$0xff]  ;;  %v303_v28 = vlaneseq }
  0x4a   :  { %775 = vmatprep.subr.bf16.mxu0 %v997_v0  ;;  %777 = vmatprep.mubr.msk.bf16.mxu0 %vm998_vm0, %v997_v0  ;;  %vm97_vm1 = vcmask 130048   ;;  %v88_v3 = vpack.c.bf16 %v87_v2, %v87_v2  ;;  %vm141_vm2 = vcmask 64512   ;;  %v999_v8 = vmov 1.0   ;;  %v853_v10 = vld [vmem:[#allocation7] sm:$0xff]   ;;  %v854_v11 = vld [vmem:[#allocation7 + $0x8] sm:$0xff]   ;;  %v855_v12 = vld [vmem:[#allocation7 + $0x10] sm:$0xff]  }
  0x4b   :  { %781 = vmatprep.subr.mxu1 %v997_v0  ;;  %783 = vmatprep.mubr.msk.f32.mxu1 %vm998_vm0, %v997_v0  ;;  %v856_v13 = vld [vmem:[#allocation7 + $0x18] sm:$0xff]   ;;  %v857_v14 = vld [vmem:[#allocation7 + $0x20] sm:$0xff]   ;;  %v858_v15 = vld [vmem:[#allocation7 + $0x28] sm:$0xff]   ;;  %v304_v30 = vshrl.u32 %v303_v28, 7  ;;  %v1000_v46 = vmov 0  }
  0x4c   :  { %776 = vmatpush3.bf16.msra.mxu0 %v852_v1  ;;  %v859_v16 = vld [vmem:[#allocation7 + $0x30] sm:$0xff]   ;;  %v860_v17 = vld [vmem:[#allocation7 + $0x38] sm:$0xff]   ;;  %v861_v53 = vld [vmem:[#allocation8] sm:$0xff]  }
  0x4d   :  { %791 = vmatprep.subr.bf16.mxu0 %v997_v0  ;;  %v291_v29 = vld [vmem:[%s1196_s2] sm:$0x1]  ;;  %v1147_v36 = vsub.s32 0, %v304_v30  ;;  %v862_v54 = vld [vmem:[#allocation8 + $0x8] sm:$0xff]   ;;  %v864_v56 = vld [vmem:[#allocation8 + $0x18] sm:$0xff]  }
  0x4e   :  { %v295_v33 = vld [vmem:[%s1197_s3] sm:$0x1]  ;;  %v865_v57 = vld [vmem:[#allocation8 + $0x20] sm:$0xff]   ;;  %v866_v58 = vld [vmem:[#allocation8 + $0x28] sm:$0xff]  }
  0x4f   :  { %778 = vmatmul.mubr.msk.bf16.vlgmr.msra.gmra.mrb[0].mxu0 %vm97_vm1, %v88_v3  ;;  %v863_v55 = vld [vmem:[#allocation8 + $0x10] sm:$0xff]   ;;  %v868_v60 = vld [vmem:[#allocation8 + $0x38] sm:$0xff]  }
  0x50   :  { %807 = vmatprep.mubr.msk.bf16.mxu0 %vm998_vm0, %v997_v0  ;;  %792 = vmatpush3.bf16.msra.mxu0 %v853_v10  ;;  %v867_v59 = vld [vmem:[#allocation8 + $0x30] sm:$0xff]  }
  0x51   :  { %793 = vmatprep.subr.bf16.mxu0 %v997_v0 }
  0x54   :  { %794 = vmatpush3.bf16.msra.mxu0 %v854_v11 }
  0x55   :  { %795 = vmatprep.subr.bf16.mxu0 %v997_v0 }
  0x58   :  { %796 = vmatpush3.bf16.msra.mxu0 %v855_v12 }
  0x59   :  { %797 = vmatprep.subr.bf16.mxu0 %v997_v0 }
  0x5c   :  { %798 = vmatpush3.bf16.msra.mxu0 %v856_v13 }
  0x5d   :  { %799 = vmatprep.subr.bf16.mxu0 %v997_v0 }
  0x60   :  { %800 = vmatpush3.bf16.msra.mxu0 %v857_v14 }
  0x61   :  { %801 = vmatprep.subr.bf16.mxu0 %v997_v0 }
  0x64   :  { %802 = vmatpush3.bf16.msra.mxu0 %v858_v15 }
  0x65   :  { %803 = vmatprep.subr.bf16.mxu0 %v997_v0 }
  0x68   :  { %804 = vmatpush3.bf16.msra.mxu0 %v859_v16 }
  0x69   :  { %805 = vmatprep.subr.bf16.mxu0 %v997_v0 }
  0x6c   :  { %806 = vmatpush3.bf16.msra.mxu0 %v860_v17 }
  0x6d   :  { %811 = vmatprep.subr.mxu0 %v997_v0 }
 0x122   :  { %v1118_v4 = vpop.f32.mrb[0].mxu0 }
 0x123   :  { %v215_v5 = vmul.f32 %v1118_v4, %v1118_v4  ;;  %v779_v6 = vpop.f32.mrb[1].mxu0  ;;  %782 = vmatpush3.msra.mxu1 %v1118_v4  ;;  %v298_v39 = vpack.c.bf16 %v1118_v4, %v1118_v4 }
 0x124   :  { %v138_v7 = vpop.f32.mrb[2].mxu0  ;;  %784 = vmatmul.mubr.msk.f32.vlgmr.msra.gmra.mrb[0].mxu1 %vm141_vm2, %v999_v8  ;;  %786 = vmatprep.subr.mxu1 %v997_v0 }
 0x125   :  { %v780_v9 = vpop.f32.mrb[3].mxu0  ;;  %787 = vmatpush3.msra.mxu1 %v215_v5  ;;  %788 = vmatprep.mubr.msk.f32.mxu1 %vm998_vm0, %v997_v0 }
 0x126   :  { %816 = vmatprep.subr.mxu1 %v997_v0 }
 0x128   :  { %789 = vmatmul.mubr.msk.f32.vlgmr.msra.gmra.mrb[2].mxu1 %vm141_vm2, %v999_v8 }
 0x129   :  { %818 = vmatprep.mubr.msk.f32.mxu1 %vm998_vm0, %v997_v0 }
 0x1f7   :  { %v211_v18 = vpop.f32.mrb[0].mxu1 }
 0x1f8   :  { %v286_v19 = vmul.f32 0.125, %v211_v18  ;;  %v785_v20 = vpop.f32.mrb[1].mxu1 }
 0x1fa   :  { %v288_v22 = vmul.f32 %v286_v19, %v286_v19 }
 0x1fb   :  { %v282_v21 = vpop.f32.mrb[2].mxu1 }
 0x1fc   :  { %v287_v23 = vmul.f32 0.125, %v282_v21  ;;  %v790_v24 = vpop.f32.mrb[3].mxu1 }
 0x1fe   :  { %v289_v25 = vsub.f32 %v287_v23, %v288_v22  ;;  %v738_v23 = vld [vmem:[%s1202_s8] ss:$0 sm:$0xff] }
 0x200   :  { %v290_v26 = vmax.f32 %v289_v25, 0.0 }
 0x202   :  { %v292_v27 = vadd.f32 1e-05, %v290_v26 }
 0x204   :  { %869 = vrsqrt.f32 %v292_v27 }
 0x20e   :  { %v870_v31 = vpop.eup %869 }
 0x20f   :  { %v294_v32 = vmul.f32 %v870_v31, %v291_v29 }
 0x211   :  { %v296_v34 = vmul.f32 %v294_v32, %v286_v19  ;;  %v299_v35 = vpack.c.bf16 %v294_v32, %v294_v32 }
 0x213   :  { %v297_v37 = vsub.f32 %v295_v33, %v296_v34  ;;  %v301_v38 = vpack.i.b16 %v299_v35, %v299_v35 }
 0x215   :  { %v306_v40 = vrot.slane %v301_v38, %v1147_v36  ;;  %v308_v41 = vpack.c.bf16 %v297_v37, %v297_v37 }
 0x217   :  { %v307_v42 = vmul.bf16 %v306_v40, %v298_v39  ;;  %v310_v43 = vpack.i.b16 %v308_v41, %v308_v41 }
 0x219   :  { %v315_v44 = vrot.slane %v310_v43, %v1147_v36 }
 0x21b   :  { %v316_v45 = vadd.bf16 %v315_v44, %v307_v42 }
 0x21d   :  { %v317_v47 = vmax.bf16 %v1000_v46, %v316_v45 }
 0x21f   :  { %808 = vmatmul.mubr.bf16.vlgmr.msra.gmra.mrb[4].mxu0 %v317_v47 }
 0x220   :  { %813 = vmatprep.mubr.msk.f32.mxu0 %vm998_vm0, %v997_v0 }
 0x2f2   :  { %v416_v48 = vpop.f32.mrb[4].mxu0 }
 0x2f3   :  { %v492_v49 = vmul.f32 %v416_v48, %v416_v48  ;;  %v809_v50 = vpop.f32.mrb[5].mxu0  ;;  %812 = vmatpush3.msra.mxu0 %v416_v48  ;;  %v575_v15 = vpack.c.bf16 %v416_v48, %v416_v48 }
 0x2f4   :  { %v419_v51 = vpop.f32.mrb[6].mxu0  ;;  %814 = vmatmul.mubr.msk.f32.vlgmr.msra.gmra.mrb[8].mxu0 %vm141_vm2, %v999_v8 }
 0x2f5   :  { %v810_v52 = vpop.f32.mrb[7].mxu0  ;;  %817 = vmatpush3.msra.mxu1 %v492_v49 }
 0x2f6   :  { %819 = vmatmul.mubr.msk.f32.vlgmr.msra.gmra.mrb[4].mxu1 %vm141_vm2, %v999_v8  ;;  %821 = vmatprep.subr.bf16.mxu1 %v997_v0  ;;  %v568_v8 = vld [vmem:[%s1199_s5] sm:$0x1] }
 0x2f7   :  { %837 = vmatprep.mubr.msk.bf16.mxu1 %vm998_vm0, %v997_v0  ;;  %822 = vmatpush3.bf16.msra.mxu1 %v861_v53 }
 0x2f8   :  { %823 = vmatprep.subr.bf16.mxu1 %v997_v0 }
 0x2fb   :  { %824 = vmatpush3.bf16.msra.mxu1 %v862_v54 }
 0x2fc   :  { %825 = vmatprep.subr.bf16.mxu1 %v997_v0 }
 0x2ff   :  { %826 = vmatpush3.bf16.msra.mxu1 %v863_v55 }
 0x300   :  { %827 = vmatprep.subr.bf16.mxu1 %v997_v0 }
 0x303   :  { %828 = vmatpush3.bf16.msra.mxu1 %v864_v56 }
 0x304   :  { %829 = vmatprep.subr.bf16.mxu1 %v997_v0 }
 0x307   :  { %830 = vmatpush3.bf16.msra.mxu1 %v865_v57 }
 0x308   :  { %831 = vmatprep.subr.bf16.mxu1 %v997_v0 }
 0x30b   :  { %832 = vmatpush3.bf16.msra.mxu1 %v866_v58 }
 0x30c   :  { %833 = vmatprep.subr.bf16.mxu1 %v997_v0 }
 0x30f   :  { %834 = vmatpush3.bf16.msra.mxu1 %v867_v59 }
 0x310   :  { %835 = vmatprep.subr.bf16.mxu1 %v997_v0  ;;  %v572_v0 = vld [vmem:[%s1200_s6] sm:$0x1]  ;;  %s1001_s6 = smov [#allocation10]  }
 0x311   :  { %s713_s21 = sshll.u32 %s1001_s6, 4  ;;  %s714_s21 = int_to_ptr.vmem [resolvable:$true] %s713_s21 }
 0x312   :  { %s961_s22 = scalar_lea.vmem %s714_s21, 128  ;;  %p966_p5 = scmp.lt.s32.totalorder %s714_s21, %s714_s21 }
 0x313   :  { %836 = vmatpush3.bf16.msra.mxu1 %v868_v60  ;;  %p962_p4 = scmp.ne.s32.totalorder %s714_s21, %s961_s22  ;;  %p967_p6 = scmp.lt.s32.totalorder %s961_s22, %s961_s22 }
 0x315   :  { %p968_p7 = por %p967_p6, %p966_p5 }
 0x317   :  { %p969_p8 = pnand %p968_p7, %p962_p4 }
 0x3c7   :  { %v488_v61 = vpop.f32.mrb[8].mxu0 }
 0x3c8   :  { %v563_v62 = vmul.f32 0.125, %v488_v61  ;;  %v815_v63 = vpop.f32.mrb[9].mxu0 }
 0x3c9   :  { %v559_v1 = vpop.f32.mrb[4].mxu1 }
 0x3ca   :  { %v565_v2 = vmul.f32 %v563_v62, %v563_v62  ;;  %v564_v3 = vmul.f32 0.125, %v559_v1  ;;  %v820_v4 = vpop.f32.mrb[5].mxu1 }
 0x3cc   :  { %v566_v5 = vsub.f32 %v564_v3, %v565_v2 }
 0x3ce   :  { %v567_v6 = vmax.f32 %v566_v5, 0.0 }
 0x3d0   :  { %v569_v7 = vadd.f32 1e-05, %v567_v6 }
 0x3d2   :  { %871 = vrsqrt.f32 %v569_v7 }
 0x3dc   :  { %v872_v9 = vpop.eup %871 }
 0x3dd   :  { %v571_v10 = vmul.f32 %v872_v9, %v568_v8 }
 0x3df   :  { %v573_v11 = vmul.f32 %v571_v10, %v563_v62  ;;  %v576_v12 = vpack.c.bf16 %v571_v10, %v571_v10 }
 0x3e1   :  { %v574_v13 = vsub.f32 %v572_v0, %v573_v11  ;;  %v578_v14 = vpack.i.b16 %v576_v12, %v576_v12 }
 0x3e3   :  { %v583_v16 = vrot.slane %v578_v14, %v1147_v36  ;;  %v585_v17 = vpack.c.bf16 %v574_v13, %v574_v13 }
 0x3e5   :  { %v584_v18 = vmul.bf16 %v583_v16, %v575_v15  ;;  %v587_v19 = vpack.i.b16 %v585_v17, %v585_v17 }
 0x3e7   :  { %v592_v20 = vrot.slane %v587_v19, %v1147_v36 }
 0x3e9   :  { %v593_v21 = vadd.bf16 %v592_v20, %v584_v18 }
 0x3eb   :  { %v594_v22 = vmax.bf16 %v1000_v46, %v593_v21 }
 0x3ed   :  { %838 = vmatmul.mubr.bf16.vlgmr.msra.gmra.mrb[8].mxu1 %v594_v22 }
 0x4c0   :  { %v700_v24 = vpop.f32.mrb[8].mxu1 }
 0x4c1   :  { %v701_v25 = vadd.f32 %v738_v23, %v700_v24  ;;  %v839_v26 = vpop.f32.mrb[9].mxu1 }
 0x4c2   :  { %v703_v27 = vpop.f32.mrb[10].mxu1 }
 0x4c3   :  { %706 = vst [vmem:[#allocation10] sm:$0xff] %v701_v25  ;;  %v840_v28 = vpop.f32.mrb[11].mxu1 }
 0x4c4   :  { %972 = shalt.err (!%p969_p8)
}
 0x4c5   :  { %s973_s8 = scalar_lea.hbm %s1203_s9, 128 }
 0x4c6   :  { %p974_p9 = scmp.ne.s32.totalorder %s1203_s9, %s973_s8  ;;  %p977_p10 = scmp.lt.u32.totalorder %s973_s8, %s1203_s9 }
 0x4c8   :  { %p979_p11 = pnand %p977_p10, %p974_p9 }
 0x4ca   :  { %982 = shalt.err (!%p979_p11)
}
 0x4cb   :  { %716 = dma.vmem_to_hbm [thread:$0]  %s714_s21, 128, %s1203_s9, [#allocation4]  }
 0x4cc   :  { %989 = dma.done.wait [#allocation4], 128  }
 0x4cd   :  { %990 = vsyncadd [#allocation4], 4294967168 }
 0x4ce   :  { %720 = vsyncpa [#allocation3], 1 }
 0x4cf   :  { %721 = vsyncpa [#allocation6], 1 }
 0x4d0   :  { %722 = vsyncpa [#allocation9], 1 }
 0x4d1   :  { %723 = vsyncpa [#allocation4], 1 }

</bundles_post_ra>
